<compile_context>
chip_gen: v7x
topology: tpu7x:2x2x1
jax: 0.10.0
libtpu: 0.0.40
codegen_flags: <defaults>
</compile_context>

<pallas_src>
import functools
import math

import jax
import jax.numpy as jnp
from jax import lax
from jax.experimental import pallas as pl
from jax.experimental.pallas import tpu as pltpu


# ------------------------------ LayerNorm kernel ------------------------------
def _layernorm_kernel(x_ref, g_ref, b_ref, o_ref, *, eps):
    # x_ref: (tB, C, tT). Normalize over C (sublane axis); every (batch, time)
    # column is independent, so tiling T does not change the math.
    x = x_ref[...].astype(jnp.float32)
    mean = jnp.mean(x, axis=1, keepdims=True)                    # (tB, 1, tT)
    centered = x - mean
    var = jnp.mean(centered * centered, axis=1, keepdims=True)   # biased var (LayerNorm)
    inv = lax.rsqrt(var + eps)                                   # EUP slot
    y = centered * inv * g_ref[...][None] + b_ref[...][None]     # gamma/beta (C,1) broadcast
    o_ref[...] = y.astype(o_ref.dtype)


def _choose_time_tile(T, C, itemsize):
    """Lane-dense time tile (multiple of 128).

    Budget: double-buffered input+output blocks (4x) plus ~3 live f32 (C, tT)
    temps must stay well inside the v7x 32 MiB scoped-VMEM default, so the
    same tiling works on v5e / v6e / v7x without re-deriving.
    """
    if T <= 256:
        return T  # keep full T in the block (also satisfies the (8,128) rule)
    per_col = C * (4 * itemsize + 3 * 4)
    tt = ((16 * 1024 * 1024) // per_col) // 128 * 128
    tt = max(128, min(tt, 2048))
    return min(tt, (T // 128) * 128)


def layer_norm(x, gamma, beta, eps=1e-5):
    """x: (B, C, T); gamma/beta: (C,). LayerNorm over C (PyTorch semantics)."""
    B, C, T = x.shape
    itemsize = jnp.dtype(x.dtype).itemsize
    tT = _choose_time_tile(T, C, itemsize)
    if tT < 128:
        # Lane-sparse T: pack several batch elements per block so the grid has
        # few, larger steps (demo shape -> single grid step for the tensor).
        tB = min(B, max(1, (1 << 20) // max(1, C * tT * itemsize)))
    else:
        tB = 1
    grid = (pl.cdiv(B, tB), pl.cdiv(T, tT))

    g2 = gamma.reshape(C, 1).astype(jnp.float32)
    b2 = beta.reshape(C, 1).astype(jnp.float32)

    block_bytes = tB * C * tT * itemsize
    vmem_limit = int(min(64 * 1024 * 1024, max(16 * 1024 * 1024, 8 * block_bytes)))

    kernel = functools.partial(_layernorm_kernel, eps=eps)
    return pl.pallas_call(
        kernel,
        out_shape=jax.ShapeDtypeStruct((B, C, T), x.dtype),
        grid_spec=pltpu.PrefetchScalarGridSpec(
            num_scalar_prefetch=0,
            grid=grid,
            in_specs=[
                pl.BlockSpec((tB, C, tT), lambda b, t: (b, 0, t)),
                pl.BlockSpec((C, 1), lambda b, t: (0, 0)),   # gamma: tiny, resident
                pl.BlockSpec((C, 1), lambda b, t: (0, 0)),   # beta:  tiny, resident
            ],
            out_specs=pl.BlockSpec((tB, C, tT), lambda b, t: (b, 0, t)),
        ),
        compiler_params=pltpu.CompilerParams(
            dimension_semantics=("parallel", "parallel"),
            vmem_limit_bytes=vmem_limit),
    )(x, g2, b2)


def layer_norm_ref(x, gamma, beta, eps=1e-5):
    mean = jnp.mean(x, axis=1, keepdims=True)
    c = x - mean
    var = jnp.mean(c * c, axis=1, keepdims=True)
    return c * lax.rsqrt(var + eps) * gamma[None, :, None] + beta[None, :, None]


# ------------------------------ Attention kernel ------------------------------
def _attention_kernel(q_ref, k_ref, v_ref, m_ref, o_ref, *, scale):
    q = q_ref[0].astype(jnp.float32) * scale           # (H, Tt, D)
    k = k_ref[0].astype(jnp.float32)                   # (H, Ts, D)
    v = v_ref[0].astype(jnp.float32)                   # (H, Ts, D)
    m = m_ref[0, 0]                                    # (Tt, Ts), 0/1 float mask
    s = jnp.einsum('htd,hsd->hts', q, k, preferred_element_type=jnp.float32)
    s = jnp.where(m[None, :, :] == 0, jnp.float32(-1e4), s)   # masked_fill(-1e4)
    s = s - jnp.max(s, axis=-1, keepdims=True)
    p = jnp.exp(s)
    p = p / jnp.sum(p, axis=-1, keepdims=True)
    o = jnp.einsum('hts,hsd->htd', p, v, preferred_element_type=jnp.float32)
    o_ref[0] = o.astype(o_ref.dtype)


def attention_pallas(q, k, v, mask, *, scale):
    """q: (B,H,Tt,D), k/v: (B,H,Ts,D), mask: (B,1,Tt,Ts) -> (B,H,Tt,D)."""
    B, H, Tt, D = q.shape
    Ts = k.shape[2]
    kernel = functools.partial(_attention_kernel, scale=scale)
    return pl.pallas_call(
        kernel,
        out_shape=jax.ShapeDtypeStruct((B, H, Tt, D), q.dtype),
        grid_spec=pltpu.PrefetchScalarGridSpec(
            num_scalar_prefetch=0,
            grid=(B,),
            in_specs=[
                pl.BlockSpec((1, H, Tt, D), lambda b: (b, 0, 0, 0)),
                pl.BlockSpec((1, H, Ts, D), lambda b: (b, 0, 0, 0)),
                pl.BlockSpec((1, H, Ts, D), lambda b: (b, 0, 0, 0)),
                pl.BlockSpec((1, 1, Tt, Ts), lambda b: (b, 0, 0, 0)),
            ],
            out_specs=pl.BlockSpec((1, H, Tt, D), lambda b: (b, 0, 0, 0)),
        ),
        compiler_params=pltpu.CompilerParams(
            dimension_semantics=("parallel",)),
    )(q, k, v, mask)


def attention_ref(q, k, v, mask, *, scale):
    s = jnp.einsum('bhtd,bhsd->bhts', q * scale, k)
    s = jnp.where(mask == 0, jnp.float32(-1e4), s)
    p = jax.nn.softmax(s, axis=-1)
    return jnp.einsum('bhts,bhsd->bhtd', p, v)


# ------------------------- plain-JAX projections / FFN ------------------------
# TODO(synk): 1x1 conv projections and the causal FFN convs are left as
# plain-JAX einsums (simple matmuls handled well by XLA); they are not the
# memory-bound hot spots targeted by the Pallas kernels above.
def conv1x1(x, w, b):
    # x: (B, Cin, T), w: (Cout, Cin), b: (Cout,)
    return jnp.einsum('oi,bit->bot', w, x) + b[None, :, None]


def causal_conv1d(x, w, b):
    # x: (B, Cin, T), w: (Cout, Cin, K), b: (Cout,); left-pad K-1 (causal).
    K = w.shape[-1]
    T = x.shape[-1]
    xp = jnp.pad(x, ((0, 0), (0, 0), (K - 1, 0))) if K > 1 else x
    y = b[None, :, None]
    for k in range(K):
        y = y + jnp.einsum('oi,bit->bot', w[:, :, k], xp[:, :, k:k + T])
    return y


def multi_head_attention(x, c, attn_mask, p, n_heads, attn_fn):
    B, C, Tt = x.shape
    Ts = c.shape[2]
    d = C // n_heads
    q = conv1x1(x, p['wq'], p['bq'])
    k = conv1x1(c, p['wk'], p['bk'])
    v = conv1x1(c, p['wv'], p['bv'])
    qh = q.reshape(B, n_heads, d, Tt).transpose(0, 1, 3, 2)
    kh = k.reshape(B, n_heads, d, Ts).transpose(0, 1, 3, 2)
    vh = v.reshape(B, n_heads, d, Ts).transpose(0, 1, 3, 2)
    mask = jnp.broadcast_to(attn_mask, (B, 1, Tt, Ts)).astype(jnp.float32)
    o = attn_fn(qh, kh, vh, mask, scale=1.0 / math.sqrt(d))
    o = o.transpose(0, 1, 3, 2).reshape(B, C, Tt)
    return conv1x1(o, p['wo'], p['bo'])


def ffn(x, x_mask, p):
    y = causal_conv1d(x * x_mask, p['w1'], p['b1'])
    y = jax.nn.relu(y)                      # activation=None in the module -> relu
    y = causal_conv1d(y * x_mask, p['w2'], p['b2'])
    return y * x_mask


def decoder_forward(x, x_mask, h, h_mask, params, n_heads, *, use_pallas=True):
    B, C, Tt = x.shape
    ln = layer_norm if use_pallas else layer_norm_ref
    attn_fn = attention_pallas if use_pallas else attention_ref

    self_attn_mask = jnp.tril(jnp.ones((Tt, Tt), jnp.float32))[None, None]   # (1,1,Tt,Tt)
    encdec_attn_mask = h_mask[:, :, None, :] * x_mask[:, :, :, None]         # (B,1,Tt,Ts)

    x = x * x_mask
    for lp in params['layers']:
        y = multi_head_attention(x, x, self_attn_mask, lp['self_attn'], n_heads, attn_fn)
        x = ln(x + y, lp['norm0_g'], lp['norm0_b'])                # dropout p=0 -> identity
        y = multi_head_attention(x, h, encdec_attn_mask, lp['encdec_attn'], n_heads, attn_fn)
        x = ln(x + y, lp['norm1_g'], lp['norm1_b'])
        y = ffn(x, x_mask, lp['ffn'])
        x = ln(x + y, lp['norm2_g'], lp['norm2_b'])
    return x * x_mask


def init_params(key, hidden, filter_channels, n_layers, kernel_size):
    def w(k, shape, scale=0.1):
        return scale * jax.random.normal(k, shape, jnp.float32)

    layers = []
    for lk in jax.random.split(key, n_layers):
        ks = jax.random.split(lk, 9)
        wq, bq = w(ks[0], (hidden, hidden)), jnp.zeros((hidden,), jnp.float32)
        layers.append(dict(
            # proximal_init=True: conv_k weights/bias start as a copy of conv_q
            self_attn=dict(wq=wq, bq=bq, wk=wq, bk=bq,
                           wv=w(ks[1], (hidden, hidden)), bv=jnp.zeros((hidden,), jnp.float32),
                           wo=w(ks[2], (hidden, hidden)), bo=jnp.zeros((hidden,), jnp.float32)),
            encdec_attn=dict(wq=w(ks[3], (hidden, hidden)), bq=jnp.zeros((hidden,), jnp.float32),
                             wk=w(ks[4], (hidden, hidden)), bk=jnp.zeros((hidden,), jnp.float32),
                             wv=w(ks[5], (hidden, hidden)), bv=jnp.zeros((hidden,), jnp.float32),
                             wo=w(ks[6], (hidden, hidden)), bo=jnp.zeros((hidden,), jnp.float32)),
            ffn=dict(w1=w(ks[7], (filter_channels, hidden, kernel_size)),
                     b1=jnp.zeros((filter_channels,), jnp.float32),
                     w2=w(ks[8], (hidden, filter_channels, kernel_size)),
                     b2=jnp.zeros((hidden,), jnp.float32)),
            norm0_g=jnp.ones((hidden,), jnp.float32), norm0_b=jnp.zeros((hidden,), jnp.float32),
            norm1_g=jnp.ones((hidden,), jnp.float32), norm1_b=jnp.zeros((hidden,), jnp.float32),
            norm2_g=jnp.ones((hidden,), jnp.float32), norm2_b=jnp.zeros((hidden,), jnp.float32),
        ))
    return dict(layers=layers)


if __name__ == "__main__":
    # Make XLA-side and Pallas-side f32 matmuls numerically comparable.
    jax.config.update("jax_default_matmul_precision", "highest")

    key = jax.random.PRNGKey(0)
    B, hidden, filter_channels = 2, 32, 64
    n_heads, n_layers, kernel_size = 4, 2, 3
    T_dec, T_enc = 16, 8

    k_x, k_h, k_p = jax.random.split(key, 3)
    x = jax.random.normal(k_x, (B, hidden, T_dec), jnp.float32)
    h = jax.random.normal(k_h, (B, hidden, T_enc), jnp.float32)
    x_len = jnp.array([T_dec, 12])
    h_len = jnp.array([T_enc, 6])
    x_mask = (jnp.arange(T_dec)[None, :] < x_len[:, None]).astype(jnp.float32)[:, None, :]
    h_mask = (jnp.arange(T_enc)[None, :] < h_len[:, None]).astype(jnp.float32)[:, None, :]

    params = init_params(k_p, hidden, filter_channels, n_layers, kernel_size)

    out = decoder_forward(x, x_mask, h, h_mask, params, n_heads, use_pallas=True)
    out = jax.block_until_ready(out)

    # Pure-JAX reference (same math, no Pallas) for an in-script sanity check.
    ref = decoder_forward(x, x_mask, h, h_mask, params, n_heads, use_pallas=False)
    ref = jax.block_until_ready(ref)

    assert out.shape == (B, hidden, T_dec)
    assert bool(jnp.all(jnp.isfinite(out)))
    assert jnp.allclose(out, ref, atol=1e-3, rtol=1e-3), float(jnp.max(jnp.abs(out - ref)))

    print("KERNEL_OK")
</pallas_src>

<mosaic_0001>
module attributes {stable_mosaic.version = 11 : i64} {
  func.func @_attention_kernel(%arg0: i32, %arg1: memref<1x4x16x8xf32, #tpu.memory_space<vmem>>, %arg2: memref<1x4x16x8xf32, #tpu.memory_space<vmem>>, %arg3: memref<1x4x16x8xf32, #tpu.memory_space<vmem>>, %arg4: memref<1x1x16x16xf32, #tpu.memory_space<vmem>>, %arg5: memref<1x4x16x8xf32, #tpu.memory_space<vmem>>) attributes {dimension_semantics = [#tpu.dimension_semantics<parallel>], iteration_bounds = array<i64: 2>, scalar_prefetch = 0 : i64, scratch_operands = 0 : i64, tpu.core_type = #tpu.core_type<tc>, window_params = [{transform_indices = @transform_0, window_bounds = array<i64: 1, 4, 16, 8>}, {transform_indices = @transform_1, window_bounds = array<i64: 1, 4, 16, 8>}, {transform_indices = @transform_2, window_bounds = array<i64: 1, 4, 16, 8>}, {transform_indices = @transform_3, window_bounds = array<i64: 1, 1, 16, 16>}, {transform_indices = @transform_4, window_bounds = array<i64: 1, 4, 16, 8>}]} {
    %c0 = arith.constant 0 : index
    %c0_0 = arith.constant 0 : index
    %c0_1 = arith.constant 0 : index
    %c0_2 = arith.constant 0 : index
    %0 = vector.load %arg1[%c0, %c0_0, %c0_1, %c0_2] : memref<1x4x16x8xf32, #tpu.memory_space<vmem>>, vector<1x4x16x8xf32>
    %1 = vector.shape_cast %0 : vector<1x4x16x8xf32> to vector<4x16x8xf32>
    %cst = arith.constant 0.353553385 : f32
    %2 = vector.broadcast %cst : f32 to vector<4x16x8xf32>
    %3 = arith.mulf %1, %2 : vector<4x16x8xf32>
    %c0_3 = arith.constant 0 : index
    %c0_4 = arith.constant 0 : index
    %c0_5 = arith.constant 0 : index
    %c0_6 = arith.constant 0 : index
    %4 = vector.load %arg2[%c0_3, %c0_4, %c0_5, %c0_6] : memref<1x4x16x8xf32, #tpu.memory_space<vmem>>, vector<1x4x16x8xf32>
    %5 = vector.shape_cast %4 : vector<1x4x16x8xf32> to vector<4x16x8xf32>
    %c0_7 = arith.constant 0 : index
    %c0_8 = arith.constant 0 : index
    %c0_9 = arith.constant 0 : index
    %c0_10 = arith.constant 0 : index
    %6 = vector.load %arg3[%c0_7, %c0_8, %c0_9, %c0_10] : memref<1x4x16x8xf32, #tpu.memory_space<vmem>>, vector<1x4x16x8xf32>
    %7 = vector.shape_cast %6 : vector<1x4x16x8xf32> to vector<4x16x8xf32>
    %c0_11 = arith.constant 0 : index
    %c0_12 = arith.constant 0 : index
    %c0_13 = arith.constant 0 : index
    %c0_14 = arith.constant 0 : index
    %8 = vector.load %arg4[%c0_11, %c0_12, %c0_13, %c0_14] : memref<1x1x16x16xf32, #tpu.memory_space<vmem>>, vector<1x1x16x16xf32>
    %9 = vector.shape_cast %8 : vector<1x1x16x16xf32> to vector<16x16xf32>
    "tpu.trace_start"() <{level = 10 : i32, message = "htd,hsd->hts"}> : () -> ()
    %cst_15 = arith.constant dense<0.000000e+00> : vector<4x16x16xf32>
    %10 = tpu.matmul %3, %5, %cst_15 {dimension_numbers = #tpu.dot_dimension_numbers<[2], [2], [1], [1], [0, 0, 0, 1, 1, 1], [0], [0]>, precision = #tpu.contract_precision<fp32>} : vector<4x16x8xf32>, vector<4x16x8xf32>, vector<4x16x16xf32> -> vector<4x16x16xf32>
    "tpu.trace_stop"() : () -> ()
    %11 = vector.shape_cast %9 : vector<16x16xf32> to vector<1x16x16xf32>
    %cst_16 = arith.constant 0.000000e+00 : f32
    %12 = vector.broadcast %cst_16 : f32 to vector<1x16x16xf32>
    %13 = arith.cmpf oeq, %11, %12 : vector<1x16x16xf32>
    %cst_17 = arith.constant -1.000000e+04 : f32
    %14 = vector.shape_cast %13 : vector<1x16x16xi1> to vector<1x16x16xi1>
    %15 = vector.broadcast %14 : vector<1x16x16xi1> to vector<4x16x16xi1>
    %16 = vector.broadcast %cst_17 : f32 to vector<4x16x16xf32>
    %17 = arith.select %15, %16, %10 : vector<4x16x16xi1>, vector<4x16x16xf32>
    %cst_18 = arith.constant dense<0xFF800000> : vector<4x16xf32>
    %18 = vector.multi_reduction <maximumf>, %17, %cst_18 [2] : vector<4x16x16xf32> to vector<4x16xf32>
    %19 = vector.shape_cast %18 : vector<4x16xf32> to vector<4x16x1xf32>
    %20 = vector.broadcast %19 : vector<4x16x1xf32> to vector<4x16x16xf32>
    %21 = arith.subf %17, %20 : vector<4x16x16xf32>
    %22 = math.exp %21 : vector<4x16x16xf32>
    %cst_19 = arith.constant dense<0.000000e+00> : vector<4x16xf32>
    %23 = vector.multi_reduction <add>, %22, %cst_19 [2] : vector<4x16x16xf32> to vector<4x16xf32>
    %24 = vector.shape_cast %23 : vector<4x16xf32> to vector<4x16x1xf32>
    %25 = vector.broadcast %24 : vector<4x16x1xf32> to vector<4x16x16xf32>
    %26 = arith.divf %22, %25 : vector<4x16x16xf32>
    "tpu.trace_start"() <{level = 10 : i32, message = "hts,hsd->htd"}> : () -> ()
    %cst_20 = arith.constant dense<0.000000e+00> : vector<4x16x8xf32>
    %27 = tpu.matmul %26, %7, %cst_20 {dimension_numbers = #tpu.dot_dimension_numbers<[2], [1], [1], [2], [0, 0, 0, 1, 1, 2], [0], [0]>, precision = #tpu.contract_precision<fp32>} : vector<4x16x16xf32>, vector<4x16x8xf32>, vector<4x16x8xf32> -> vector<4x16x8xf32>
    "tpu.trace_stop"() : () -> ()
    %c0_21 = arith.constant 0 : index
    %c0_22 = arith.constant 0 : index
    %c0_23 = arith.constant 0 : index
    %c0_24 = arith.constant 0 : index
    %28 = vector.load %arg5[%c0_21, %c0_22, %c0_23, %c0_24] : memref<1x4x16x8xf32, #tpu.memory_space<vmem>>, vector<1x4x16x8xf32>
    %29 = vector.shape_cast %28 : vector<1x4x16x8xf32> to vector<4x16x8xf32>
    %30 = vector.shape_cast %27 : vector<4x16x8xf32> to vector<1x4x16x8xf32>
    tpu.vector_store %arg5[%c0_21, %c0_22, %c0_23, %c0_24], %30 {strides = array<i32>} : memref<1x4x16x8xf32, #tpu.memory_space<vmem>>, vector<1x4x16x8xf32>,
    return
  }
  func.func @transform_0(%arg0: i32) -> (i32, i32, i32, i32) {
    %c0_i32 = arith.constant 0 : i32
    %c0_i32_0 = arith.constant 0 : i32
    %c0_i32_1 = arith.constant 0 : i32
    %c0_i32_2 = arith.constant 0 : i32
    return %arg0, %c0_i32, %c0_i32_0, %c0_i32_1 : i32, i32, i32, i32
  }
  func.func @transform_1(%arg0: i32) -> (i32, i32, i32, i32) {
    %c0_i32 = arith.constant 0 : i32
    %c0_i32_0 = arith.constant 0 : i32
    %c0_i32_1 = arith.constant 0 : i32
    %c0_i32_2 = arith.constant 0 : i32
    return %arg0, %c0_i32, %c0_i32_0, %c0_i32_1 : i32, i32, i32, i32
  }
  func.func @transform_2(%arg0: i32) -> (i32, i32, i32, i32) {
    %c0_i32 = arith.constant 0 : i32
    %c0_i32_0 = arith.constant 0 : i32
    %c0_i32_1 = arith.constant 0 : i32
    %c0_i32_2 = arith.constant 0 : i32
    return %arg0, %c0_i32, %c0_i32_0, %c0_i32_1 : i32, i32, i32, i32
  }
  func.func @transform_3(%arg0: i32) -> (i32, i32, i32, i32) {
    %c0_i32 = arith.constant 0 : i32
    %c0_i32_0 = arith.constant 0 : i32
    %c0_i32_1 = arith.constant 0 : i32
    %c0_i32_2 = arith.constant 0 : i32
    return %arg0, %c0_i32, %c0_i32_0, %c0_i32_1 : i32, i32, i32, i32
  }
  func.func @transform_4(%arg0: i32) -> (i32, i32, i32, i32) {
    %c0_i32 = arith.constant 0 : i32
    %c0_i32_0 = arith.constant 0 : i32
    %c0_i32_1 = arith.constant 0 : i32
    %c0_i32_2 = arith.constant 0 : i32
    return %arg0, %c0_i32, %c0_i32_0, %c0_i32_1 : i32, i32, i32, i32
  }
}

</mosaic_0001>

<bundles_post_ra>
// kernel: tpu_custom_call.1
= control target key start
LH: loop header
LB: loop body
LE: loop exit
PB: predicated region body
PF: predicated region fallthrough
CT: control target
= control target key end

     0   :  { %s5478_s15 = smov 0   ;;  %s5962_s0 = inlined_call_operand.vmem [shape: f32[2,4,16,8], index: 0, kind: input, shape index: {}]   ;;  %s5963_s1 = inlined_call_operand.vmem [shape: f32[2,4,16,8], index: 1, kind: input, shape index: {}]   ;;  %s5964_s2 = inlined_call_operand.vmem [shape: f32[2,4,16,8], index: 2, kind: input, shape index: {}]   ;;  %s5965_s3 = inlined_call_operand.vmem [shape: f32[2,1,16,16], index: 3, kind: input, shape index: {}]   ;;  %s5966_s4 = inlined_call_operand.vmem [shape: f32[2,4,16,8], index: 4, kind: output, shape index: {}]  }
   0x1 LB: > { %s4583_s16 = sadd.s32 4294967295, %s5451_s15   ;;  %p4587_p0 = scmp.ge.s32.totalorder %s5451_s15, 1  ;;  %s5451_s15 = sphi %s5478_s15, %s14_s15  }
   0x2   : > { %p192_p1 = scmp.lt.s32.totalorder %s5451_s15, 3 }
   0x4   : > { %p193_p2 = pnand %p4587_p0, %p192_p1 }
   0x5   : > { %p233_p3 = scmp.lt.s32.totalorder (!%p193_p2), %s4583_s16, 1  ;;  %vm292_vm0 = vcmask (!%p193_p2), 64512   ;;  %vm2363_vm3 = vcmask (!%p193_p2), 130048  }
   0x6   : > { %196 = sbr.rel (%p193_p2) target bundleno = 923 (0x39b), region = 36 }
   0xd   : > { %s5968_s16 = smov (!%p233_p3, %s4583_s16), 1 }
   0xe   : > { %s5489_s17 = sshll.u32 %s5968_s16, 6  ;;  %s4603_s24 = sshll.u32 %s5968_s16, 4 }
   0xf   : > { %s5495_s20 = scalar_lea.vmem %s5963_s1, %s5489_s17  ;;  %s5501_s23 = scalar_lea.vmem %s5962_s0, %s5489_s17 }
  0x10   : > { %v274_v0 = vld [vmem:[%s5495_s20] sm:$0xff]  ;;  %v275_v1 = vld [vmem:[%s5495_s20 + $0x8] sm:$0xff]  ;;  %v276_v2 = vld [vmem:[%s5495_s20 + $0x10] sm:$0xff]  ;;  %s252_s27 = scalar_lea.vmem %s5965_s3, %s4603_s24  ;;  %s5777_s30 = scalar_lea.vmem %s5964_s2, %s5489_s17 }
  0x11   : > { %v300_v3 = vsel %vm292_vm0, %v274_v0, 0  ;;  %v303_v4 = vsel %vm292_vm0, %v275_v1, 0  ;;  %v277_v5 = vld [vmem:[%s5495_s20 + $0x18] sm:$0xff]  ;;  %v814_v6 = vsel %vm292_vm0, %v276_v2, 0  ;;  %v258_v7 = vld [vmem:[%s5501_s23] sm:$0xff]  ;;  %v260_v8 = vld [vmem:[%s5501_s23 + $0x10] sm:$0xff]  ;;  %s257_s7 = scalar_lea.vmem %s5966_s4, %s5489_s17 }
  0x12   : > { %v306_v9 = vand.u32 4294901760, %v300_v3  ;;  %v309_v10 = vand.u32 4294901760, %v303_v4  ;;  %v817_v11 = vsel %vm292_vm0, %v277_v5, 0  ;;  %v820_v12 = vand.u32 4294901760, %v814_v6  ;;  %v259_v20 = vld [vmem:[%s5501_s23 + $0x8] sm:$0xff]  ;;  %v261_v21 = vld [vmem:[%s5501_s23 + $0x18] sm:$0xff] }
  0x13   : > { %v823_v13 = vand.u32 4294901760, %v817_v11  ;;  %v266_v14 = vmul.f32 0.35355338, %v258_v7  ;;  %v268_v15 = vmul.f32 0.35355338, %v260_v8  ;;  %v278_v2 = vld [vmem:[%s5495_s20 + $0x20] sm:$0xff] }
  0x14   : > { %v5513_v16 = vpack.c.bf16 %v309_v10, %v306_v9  ;;  %v5515_v17 = vsub.f32 %v300_v3, %v306_v9  ;;  %v5517_v18 = vsub.f32 %v303_v4, %v309_v10  ;;  %v5519_v19 = vsub.f32 %v814_v6, %v820_v12  ;;  %v279_v3 = vld [vmem:[%s5495_s20 + $0x28] sm:$0xff]  ;;  %v262_v4 = vld [vmem:[%s5501_s23 + $0x20] sm:$0xff]  ;;  %v264_v5 = vld [vmem:[%s5501_s23 + $0x30] sm:$0xff] }
  0x15   : > { %v5523_v22 = vpack.c.bf16 %v823_v13, %v820_v12  ;;  %v294_v23 = vsel %vm292_vm0, %v266_v14, 0  ;;  %v808_v24 = vsel %vm292_vm0, %v268_v15, 0  ;;  %v5527_v25 = vsub.f32 %v817_v11, %v823_v13  ;;  %v280_v6 = vld [vmem:[%s5495_s20 + $0x30] sm:$0xff]  ;;  %v281_v7 = vld [vmem:[%s5495_s20 + $0x38] sm:$0xff] }
  0x16   : > { %5134 = vmatprep.subr.bf16.mxu0 %v5513_v16  ;;  %v5530_v26 = vand.u32 4294901760, %v294_v23  ;;  %v395_v27 = vand.u32 4294901760, %v5515_v17  ;;  %v402_v28 = vand.u32 4294901760, %v5517_v18  ;;  %v5534_v29 = vand.u32 4294901760, %v808_v24 }
  0x17   : > { %5158 = vmatprep.subr.bf16.mxu1 %v5523_v22  ;;  %5136 = vmatpush3.bf16.xpose.msra.mxu0 %v5513_v16  ;;  %v909_v30 = vand.u32 4294901760, %v5519_v19  ;;  %v916_v31 = vand.u32 4294901760, %v5527_v25  ;;  %v267_v32 = vmul.f32 0.35355338, %v259_v20  ;;  %v269_v33 = vmul.f32 0.35355338, %v261_v21 }
  0x18   : > { %5160 = vmatpush3.bf16.xpose.msra.mxu1 %v5523_v22  ;;  %v5542_v34 = vsub.f32 %v294_v23, %v5530_v26  ;;  %v396_v35 = vsub.f32 %v5515_v17, %v395_v27  ;;  %v403_v36 = vsub.f32 %v5517_v18, %v402_v28  ;;  %v5551_v37 = vsub.f32 %v808_v24, %v5534_v29  ;;  %v265_v20 = vld [vmem:[%s5501_s23 + $0x38] sm:$0xff] }
  0x19   : > { %v910_v38 = vsub.f32 %v5519_v19, %v909_v30  ;;  %v917_v39 = vsub.f32 %v5527_v25, %v916_v31  ;;  %v297_v40 = vsel %vm292_vm0, %v267_v32, 0  ;;  %v811_v41 = vsel %vm292_vm0, %v269_v33, 0 }
  0x1a   : > { %v374_v42 = vand.u32 4294901760, %v5542_v34  ;;  %v397_v43 = vand.u32 4294901760, %v396_v35  ;;  %v404_v44 = vand.u32 4294901760, %v403_v36  ;;  %v888_v45 = vand.u32 4294901760, %v5551_v37 }
  0x1b   : > { %v911_v46 = vand.u32 4294901760, %v910_v38  ;;  %v918_v47 = vand.u32 4294901760, %v917_v39  ;;  %v5563_v48 = vand.u32 4294901760, %v297_v40  ;;  %v5565_v49 = vand.u32 4294901760, %v811_v41 }
  0x1c   : > { %v375_v50 = vsub.f32 %v5542_v34, %v374_v42  ;;  %v5137_v51 = vpack.c.bf16 %v404_v44, %v397_v43  ;;  %v889_v52 = vsub.f32 %v5551_v37, %v888_v45  ;;  %v5141_v0 = vpack.c.bf16 %v5517_v18, %v5515_v17 }
  0x1d   : > { %v5161_v53 = vpack.c.bf16 %v918_v47, %v911_v46  ;;  %v5572_v54 = vsub.f32 %v297_v40, %v5563_v48  ;;  %v5575_v55 = vsub.f32 %v811_v41, %v5565_v49  ;;  %v5165_v1 = vpack.c.bf16 %v5527_v25, %v5519_v19  ;;  %v263_v19 = vld [vmem:[%s5501_s23 + $0x28] sm:$0xff] }
  0x1e   : > { %v376_v56 = vand.u32 4294901760, %v375_v50  ;;  %5138 = vmatprep.subr.bf16.mxu0 %v5137_v51  ;;  %v890_v57 = vand.u32 4294901760, %v889_v52  ;;  %v5149_v8 = vpack.c.bf16 %v402_v28, %v395_v27  ;;  %v5173_v9 = vpack.c.bf16 %v916_v31, %v909_v30 }
  0x1f   : > { %5162 = vmatprep.subr.bf16.mxu1 %v5161_v53  ;;  %v384_v58 = vand.u32 4294901760, %v5572_v54  ;;  %v898_v59 = vand.u32 4294901760, %v5575_v55  ;;  %v1328_v10 = vsel %vm292_vm0, %v278_v2, 0  ;;  %v1331_v11 = vsel %vm292_vm0, %v279_v3, 0 }
  0x20   : > { %4801 = vmatprep.mubr.f32.mxu0 %v376_v56  ;;  %4843 = vmatprep.mubr.f32.mxu1 %v890_v57  ;;  %v270_v12 = vmul.f32 0.35355338, %v262_v4  ;;  %v272_v13 = vmul.f32 0.35355338, %v264_v5  ;;  %v1842_v14 = vsel %vm292_vm0, %v280_v6, 0  ;;  %v1845_v15 = vsel %vm292_vm0, %v281_v7, 0 }
  0x21   : > { %v385_v60 = vsub.f32 %v5572_v54, %v384_v58  ;;  %v899_v61 = vsub.f32 %v5575_v55, %v898_v59  ;;  %v1334_v17 = vand.u32 4294901760, %v1328_v10  ;;  %v1337_v18 = vand.u32 4294901760, %v1331_v11 }
  0x22   : > { %v1848_v21 = vand.u32 4294901760, %v1842_v14  ;;  %v1851_v23 = vand.u32 4294901760, %v1845_v15  ;;  %v1322_v24 = vsel %vm292_vm0, %v270_v12, 0  ;;  %v1836_v25 = vsel %vm292_vm0, %v272_v13, 0 }
  0x23   : > { %v386_v62 = vand.u32 4294901760, %v385_v60  ;;  %v900_v63 = vand.u32 4294901760, %v899_v61  ;;  %v271_v27 = vmul.f32 0.35355338, %v263_v19  ;;  %v273_v28 = vmul.f32 0.35355338, %v265_v20 }
  0x24   : > { %v5625_v30 = vand.u32 4294901760, %v1322_v24  ;;  %v5627_v31 = vand.u32 4294901760, %v1836_v25  ;;  %v5629_v32 = vsub.f32 %v1328_v10, %v1334_v17  ;;  %v5631_v33 = vsub.f32 %v1331_v11, %v1337_v18 }
  0x25   : > { %4802 = vmatmul.mubr.f32.vlgmr.msra.gmra.mrb[0].mxu0 %v386_v62  ;;  %4844 = vmatmul.mubr.f32.vlgmr.msra.gmra.mrb[0].mxu1 %v900_v63  ;;  %v5635_v35 = vsub.f32 %v1845_v15, %v1851_v23  ;;  %v1325_v36 = vsel %vm292_vm0, %v271_v27, 0  ;;  %v5661_v46 = vpack.c.bf16 %v1337_v18, %v1334_v17  ;;  %v5663_v47 = vpack.c.bf16 %v1851_v23, %v1848_v21 }
  0x26   : > { %5140 = vmatpush3.bf16.xpose.msra.mxu0 %v5137_v51  ;;  %5164 = vmatpush3.bf16.xpose.msra.mxu1 %v5161_v53  ;;  %v5646_v38 = vsub.f32 %v1322_v24, %v5625_v30  ;;  %v5649_v39 = vsub.f32 %v1836_v25, %v5627_v31  ;;  %v1423_v40 = vand.u32 4294901760, %v5629_v32  ;;  %v1430_v41 = vand.u32 4294901760, %v5631_v33 }
  0x27   : > { %4808 = vmatprep.mubr.f32.mxu0 %v5530_v26  ;;  %5142 = vmatprep.subr.bf16.mxu0 %v5141_v0  ;;  %v1944_v43 = vand.u32 4294901760, %v5635_v35  ;;  %v5657_v44 = vand.u32 4294901760, %v1325_v36  ;;  %v5189_v6 = vpack.c.bf16 %v5631_v33, %v5629_v32 }
  0x28   : > { %4850 = vmatprep.mubr.f32.mxu1 %v5534_v29  ;;  %5166 = vmatprep.subr.bf16.mxu1 %v5165_v1  ;;  %v1402_v50 = vand.u32 4294901760, %v5646_v38  ;;  %v1916_v51 = vand.u32 4294901760, %v5649_v39  ;;  %v1424_v52 = vsub.f32 %v5629_v32, %v1423_v40  ;;  %v1431_v53 = vsub.f32 %v5631_v33, %v1430_v41 }
  0x29   : > { %v1411_v56 = vsub.f32 %v1325_v36, %v5657_v44 }
  0x2a   : > { %v1425_v60 = vand.u32 4294901760, %v1424_v52 }
  0x2b   : > { %v1412_v62 = vand.u32 4294901760, %v1411_v56 }
  0x2d   : > { %4809 = vmatmul.mubr.f32.vlgmr.msra.gmra.mrb[0].mxu0 %v5563_v48  ;;  %4851 = vmatmul.mubr.f32.vlgmr.msra.gmra.mrb[0].mxu1 %v5565_v49  ;;  %v1413_v2 = vsub.f32 %v1411_v56, %v1412_v62 }
  0x2e   : > { %5144 = vmatpush3.bf16.xpose.msra.mxu0 %v5141_v0  ;;  %5168 = vmatpush3.bf16.xpose.msra.mxu1 %v5165_v1 }
  0x2f   : > { %4815 = vmatprep.mubr.f32.mxu0 %v5542_v34  ;;  %5146 = vmatprep.subr.bf16.mxu0 %v5513_v16  ;;  %v5633_v34 = vsub.f32 %v1842_v14, %v1848_v21  ;;  %v1414_v4 = vand.u32 4294901760, %v1413_v2 }
  0x30   : > { %4857 = vmatprep.mubr.f32.mxu1 %v5551_v37  ;;  %5170 = vmatprep.subr.bf16.mxu1 %v5523_v22  ;;  %v1839_v37 = vsel %vm292_vm0, %v273_v28, 0 }
  0x35   : > { %4816 = vmatmul.mubr.f32.vlgmr.msra.gmra.mrb[0].mxu0 %v5572_v54  ;;  %4858 = vmatmul.mubr.f32.vlgmr.msra.gmra.mrb[0].mxu1 %v5575_v55  ;;  %v1945_v55 = vsub.f32 %v5635_v35, %v1944_v43 }
  0x36   : > { %5148 = vmatpush3.bf16.xpose.msra.mxu0 %v5513_v16  ;;  %5172 = vmatpush3.bf16.xpose.msra.mxu1 %v5523_v22 }
  0x37   : > { %4822 = vmatprep.mubr.f32.mxu0 %v374_v42  ;;  %5150 = vmatprep.subr.bf16.mxu0 %v5149_v8  ;;  %v1937_v42 = vand.u32 4294901760, %v5633_v34 }
  0x38   : > { %4864 = vmatprep.mubr.f32.mxu1 %v888_v45  ;;  %5174 = vmatprep.subr.bf16.mxu1 %v5173_v9  ;;  %v5659_v45 = vand.u32 4294901760, %v1839_v37 }
  0x39   : > { %v1938_v54 = vsub.f32 %v5633_v34, %v1937_v42  ;;  %v5221_v7 = vpack.c.bf16 %v1944_v43, %v1937_v42 }
  0x3a   : > { %v1925_v57 = vsub.f32 %v1839_v37, %v5659_v45 }
  0x3b   : > { %v1939_v61 = vand.u32 4294901760, %v1938_v54 }
  0x3d   : > { %4823 = vmatmul.mubr.f32.vlgmr.msra.gmra.mrb[0].mxu0 %v384_v58  ;;  %4865 = vmatmul.mubr.f32.vlgmr.msra.gmra.mrb[0].mxu1 %v898_v59  ;;  %v1403_v58 = vsub.f32 %v5646_v38, %v1402_v50  ;;  %v1917_v59 = vsub.f32 %v5649_v39, %v1916_v51 }
  0x3e   : > { %5152 = vmatpush3.bf16.xpose.msra.mxu0 %v5149_v8  ;;  %5176 = vmatpush3.bf16.xpose.msra.mxu1 %v5173_v9  ;;  %v291_v8 = vld [vmem:[%s252_s27 + $0x8] sm:$0xff]  ;;  %v290_v9 = vld [vmem:[%s252_s27] sm:$0xff] }
  0x3f   : > { %4829 = vmatprep.mubr.f32.mxu0 %v5530_v26  ;;  %5154 = vmatprep.subr.bf16.mxu0 %v5513_v16  ;;  %v1404_v63 = vand.u32 4294901760, %v1403_v58  ;;  %vm2350_vm1 = vcmp.eq.f32.partialorder %v291_v8, 0.0  ;;  %vm2349_vm2 = vcmp.eq.f32.partialorder %v290_v9, 0.0  ;;  %v285_v8 = vld [vmem:[%s5777_s30 + $0x18] sm:$0xff] }
  0x40   : > { %4871 = vmatprep.mubr.f32.mxu1 %v5534_v29  ;;  %5178 = vmatprep.subr.bf16.mxu1 %v5523_v22 }
  0x45   : > { %4830 = vmatmul.mubr.f32.vlgmr.msra.gmra.mrb[0].mxu0 %v5563_v48  ;;  %4872 = vmatmul.mubr.f32.vlgmr.msra.gmra.mrb[0].mxu1 %v5565_v49 }
  0x46   : > { %5156 = vmatpush3.bf16.xpose.msra.mxu0 %v5513_v16  ;;  %5180 = vmatpush3.bf16.xpose.msra.mxu1 %v5523_v22  ;;  %v1432_v16 = vand.u32 4294901760, %v1431_v53  ;;  %v1946_v22 = vand.u32 4294901760, %v1945_v55 }
  0x47   : > { %4836 = vmatprep.mubr.f32.mxu0 %v5530_v26  ;;  %4878 = vmatprep.mubr.f32.mxu1 %v5534_v29  ;;  %v1926_v26 = vand.u32 4294901760, %v1925_v57  ;;  %v1918_v29 = vand.u32 4294901760, %v1917_v59 }
  0x48   : > { %5182 = vmatprep.subr.bf16.mxu0 %v5661_v46  ;;  %5206 = vmatprep.subr.bf16.mxu1 %v5663_v47  ;;  %v5185_v0 = vpack.c.bf16 %v1432_v16, %v1425_v60  ;;  %v5209_v1 = vpack.c.bf16 %v1946_v22, %v1939_v61 }
  0x49   : > { %v1927_v3 = vsub.f32 %v1925_v57, %v1926_v26 }
  0x4b   : > { %v1928_v5 = vand.u32 4294901760, %v1927_v3 }
  0x4d   : > { %4837 = vmatmul.mubr.f32.vlgmr.msra.gmra.mrb[0].mxu0 %v5563_v48  ;;  %4879 = vmatmul.mubr.f32.vlgmr.msra.gmra.mrb[0].mxu1 %v5565_v49  ;;  %v5213_v48 = vpack.c.bf16 %v5635_v35, %v5633_v34  ;;  %v5197_v49 = vpack.c.bf16 %v1430_v41, %v1423_v40 }
  0x4e   : > { %5184 = vmatpush3.bf16.xpose.msra.mxu0 %v5661_v46  ;;  %5208 = vmatpush3.bf16.xpose.msra.mxu1 %v5663_v47 }
  0x4f   : > { %4885 = vmatprep.mubr.f32.mxu0 %v1404_v63  ;;  %4927 = vmatprep.mubr.f32.mxu1 %v1918_v29  ;;  %v282_v63 = vld [vmem:[%s5777_s30] sm:$0xff]  ;;  %v283_v29 = vld [vmem:[%s5777_s30 + $0x8] sm:$0xff] }
  0x50   : > { %5186 = vmatprep.subr.bf16.mxu0 %v5185_v0  ;;  %5210 = vmatprep.subr.bf16.mxu1 %v5209_v1  ;;  %v2459_v2 = vand.u32 4294901760, %v282_v63  ;;  %v2462_v3 = vand.u32 4294901760, %v283_v29 }
  0x52   : > { %v2547_v9 = vsub.f32 %v282_v63, %v2459_v2 }
  0x55   : > { %4886 = vmatmul.mubr.f32.vlgmr.msra.gmra.mrb[2].mxu0 %v1414_v4  ;;  %4928 = vmatmul.mubr.f32.vlgmr.msra.gmra.mrb[2].mxu1 %v1928_v5 }
  0x56   : > { %5188 = vmatpush3.bf16.xpose.msra.mxu0 %v5185_v0  ;;  %5212 = vmatpush3.bf16.xpose.msra.mxu1 %v5209_v1 }
  0x57   : > { %4892 = vmatprep.mubr.f32.mxu0 %v5625_v30  ;;  %4934 = vmatprep.mubr.f32.mxu1 %v5627_v31 }
  0x58   : > { %5190 = vmatprep.subr.bf16.mxu0 %v5189_v6  ;;  %5214 = vmatprep.subr.bf16.mxu1 %v5213_v48 }
  0x5d   : > { %4893 = vmatmul.mubr.f32.vlgmr.msra.gmra.mrb[2].mxu0 %v5657_v44  ;;  %4935 = vmatmul.mubr.f32.vlgmr.msra.gmra.mrb[2].mxu1 %v5659_v45 }
  0x5e   : > { %5192 = vmatpush3.bf16.xpose.msra.mxu0 %v5189_v6  ;;  %5216 = vmatpush3.bf16.xpose.msra.mxu1 %v5213_v48  ;;  %v5781_v6 = vpack.c.bf16 %v2462_v3, %v2459_v2 }
  0x5f   : > { %4899 = vmatprep.mubr.f32.mxu0 %v5646_v38  ;;  %4941 = vmatprep.mubr.f32.mxu1 %v5649_v39 }
  0x60   : > { %5194 = vmatprep.subr.bf16.mxu0 %v5661_v46  ;;  %5218 = vmatprep.subr.bf16.mxu1 %v5663_v47 }
  0x65   : > { %4900 = vmatmul.mubr.f32.vlgmr.msra.gmra.mrb[2].mxu0 %v1411_v56  ;;  %4942 = vmatmul.mubr.f32.vlgmr.msra.gmra.mrb[2].mxu1 %v1925_v57 }
  0x66   : > { %5196 = vmatpush3.bf16.xpose.msra.mxu0 %v5661_v46  ;;  %5220 = vmatpush3.bf16.xpose.msra.mxu1 %v5663_v47 }
  0x67   : > { %4906 = vmatprep.mubr.f32.mxu0 %v1402_v50  ;;  %4948 = vmatprep.mubr.f32.mxu1 %v1916_v51 }
  0x68   : > { %5198 = vmatprep.subr.bf16.mxu0 %v5197_v49  ;;  %5222 = vmatprep.subr.bf16.mxu1 %v5221_v7 }
  0x6d   : > { %4907 = vmatmul.mubr.f32.vlgmr.msra.gmra.mrb[2].mxu0 %v1412_v62  ;;  %4949 = vmatmul.mubr.f32.vlgmr.msra.gmra.mrb[2].mxu1 %v1926_v26 }
  0x6e   : > { %5200 = vmatpush3.bf16.xpose.msra.mxu0 %v5197_v49  ;;  %5224 = vmatpush3.bf16.xpose.msra.mxu1 %v5221_v7  ;;  %v284_v7 = vld [vmem:[%s5777_s30 + $0x10] sm:$0xff] }
  0x6f   : > { %4913 = vmatprep.mubr.f32.mxu0 %v5625_v30  ;;  %4955 = vmatprep.mubr.f32.mxu1 %v5627_v31 }
  0x70   : > { %5202 = vmatprep.subr.bf16.mxu0 %v5661_v46  ;;  %5226 = vmatprep.subr.bf16.mxu1 %v5663_v47 }
  0x75   : > { %4914 = vmatmul.mubr.f32.vlgmr.msra.gmra.mrb[2].mxu0 %v5657_v44  ;;  %4956 = vmatmul.mubr.f32.vlgmr.msra.gmra.mrb[2].mxu1 %v5659_v45 }
  0x76   : > { %5204 = vmatpush3.bf16.xpose.msra.mxu0 %v5661_v46  ;;  %5228 = vmatpush3.bf16.xpose.msra.mxu1 %v5663_v47 }
  0x77   : > { %4920 = vmatprep.mubr.f32.mxu0 %v5625_v30  ;;  %4962 = vmatprep.mubr.f32.mxu1 %v5627_v31 }
  0x78   : > { %5230 = vmatprep.subr.bf16.mxu0 %v5781_v6 }
  0x7d   : > { %4921 = vmatmul.mubr.f32.vlgmr.msra.gmra.mrb[2].mxu0 %v5657_v44  ;;  %4963 = vmatmul.mubr.f32.vlgmr.msra.gmra.mrb[2].mxu1 %v5659_v45 }
  0x7e   : > { %5232 = vmatpush3.bf16.msra.mxu0 %v5781_v6 }
 0x120   : > { %v4838_v10 = vpop.f32.mrb[0].mxu0  ;;  %v4880_v11 = vpop.f32.mrb[0].mxu1 }
 0x121   : > { %v2356_v12 = vsel %vm2350_vm1, -10000.0, %v4838_v10  ;;  %v2358_v13 = vsel %vm2350_vm1, -10000.0, %v4880_v11  ;;  %v797_v14 = vpop.f32.mrb[1].mxu0  ;;  %v1311_v15 = vpop.f32.mrb[1].mxu1  ;;  %v2554_v10 = vsub.f32 %v283_v29, %v2462_v3  ;;  %v2967_v11 = vand.u32 4294901760, %v284_v7 }
 0x122   : > { %v2355_v17 = vsel %vm2349_vm2, -10000.0, %v797_v14  ;;  %v2357_v18 = vsel %vm2349_vm2, -10000.0, %v1311_v15  ;;  %v2367_v19 = vsel %vm2363_vm3, %v2356_v12, -inf  ;;  %v2373_v21 = vsel %vm2363_vm3, %v2358_v13, -inf }
 0x123   : > { %2368 = vmax.xlane.f32.xlu1 %v2367_v19  ;;  %v2364_v20 = vsel %vm2363_vm3, %v2355_v17, -inf  ;;  %v2370_v23 = vsel %vm2363_vm3, %v2357_v18, -inf  ;;  %v2555_v14 = vand.u32 4294901760, %v2554_v10  ;;  %v3055_v19 = vsub.f32 %v284_v7, %v2967_v11 }
 0x124   : > { %2365 = vmax.xlane.f32.xlu0 %v2364_v20 }
 0x127   : > { %2374 = vmax.xlane.f32.xlu1 %v2373_v21 }
 0x128   : > { %2371 = vmax.xlane.f32.xlu0 %v2370_v23 }
 0x150   : > { %v4922_v24 = vpop.f32.mrb[2].mxu0  ;;  %v4964_v25 = vpop.f32.mrb[2].mxu1 }
 0x151   : > { %v2360_v27 = vsel %vm2350_vm1, -10000.0, %v4922_v24  ;;  %v2362_v28 = vsel %vm2350_vm1, -10000.0, %v4964_v25  ;;  %v1825_v30 = vpop.f32.mrb[3].mxu0  ;;  %v2339_v31 = vpop.f32.mrb[3].mxu1  ;;  %v3056_v24 = vand.u32 4294901760, %v3055_v19 }
 0x152   : > { %v2359_v32 = vsel %vm2349_vm2, -10000.0, %v1825_v30  ;;  %v2361_v33 = vsel %vm2349_vm2, -10000.0, %v2339_v31  ;;  %v2385_v36 = vsel %vm2363_vm3, %v2362_v28, -inf  ;;  %v2379_v37 = vsel %vm2363_vm3, %v2360_v27, -inf }
 0x153   : > { %v2382_v34 = vsel %vm2363_vm3, %v2361_v33, -inf  ;;  %v2376_v35 = vsel %vm2363_vm3, %v2359_v32, -inf  ;;  %v3057_v30 = vsub.f32 %v3055_v19, %v3056_v24 }
 0x154   : > { %2383 = vmax.xlane.f32.xlu1 %v2382_v34  ;;  %2377 = vmax.xlane.f32.xlu0 %v2376_v35 }
 0x155   : > { %v3058_v35 = vand.u32 4294901760, %v3057_v30 }
 0x158   : > { %2386 = vmax.xlane.f32.xlu1 %v2385_v36  ;;  %2380 = vmax.xlane.f32.xlu0 %v2379_v37 }
 0x1b0   : > { %v2369_v38 = vpop.xlane.xlu1 %2368 }
 0x1b1   : > { %v2389_v39 = vsub.f32 %v2356_v12, %v2369_v38  ;;  %v2366_v40 = vpop.xlane.xlu0 %2365  ;;  %v2970_v12 = vand.u32 4294901760, %v285_v8 }
 0x1b2   : > { %v2388_v41 = vsub.f32 %v2355_v17, %v2366_v40 }
 0x1b3   : > { %v2398_v42 = vmul.f32 1.442695, %v2389_v39  ;;  %v5787_v15 = vpack.c.bf16 %v2970_v12, %v2967_v11  ;;  %v3062_v20 = vsub.f32 %v285_v8, %v2970_v12 }
 0x1b4   : > { %v2396_v43 = vmul.f32 1.442695, %v2388_v41  ;;  %v2375_v44 = vpop.xlane.xlu1 %2374 }
 0x1b5   : > { %v2391_v45 = vsub.f32 %v2358_v13, %v2375_v44  ;;  %v2372_v46 = vpop.xlane.xlu0 %2371  ;;  %v2548_v13 = vand.u32 4294901760, %v2547_v9  ;;  %5254 = vmatprep.subr.bf16.mxu1 %v5787_v15  ;;  %v3063_v25 = vand.u32 4294901760, %v3062_v20 }
 0x1b6   : > { %5413 = vpow2.f32 %v2396_v43  ;;  %v2390_v47 = vsub.f32 %v2357_v18, %v2372_v46  ;;  %v2556_v18 = vsub.f32 %v2554_v10, %v2555_v14  ;;  %5256 = vmatpush3.bf16.msra.mxu1 %v5787_v15  ;;  %v5261_v43 = vpack.c.bf16 %v3062_v20, %v3055_v19  ;;  %v288_v19 = vld [vmem:[%s5777_s30 + $0x30] sm:$0xff] }
 0x1b7   : > { %5415 = vpow2.f32 %v2398_v42  ;;  %v2402_v50 = vmul.f32 1.442695, %v2391_v45  ;;  %v2549_v17 = vsub.f32 %v2547_v9, %v2548_v13  ;;  %v3064_v31 = vsub.f32 %v3062_v20, %v3063_v25 }
 0x1b8   : > { %v2400_v51 = vmul.f32 1.442695, %v2390_v47  ;;  %v2557_v23 = vand.u32 4294901760, %v2556_v18  ;;  %v5237_v42 = vpack.c.bf16 %v2554_v10, %v2547_v9  ;;  %v5810_v44 = vpack.c.bf16 %v2555_v14, %v2548_v13  ;;  %v287_v18 = vld [vmem:[%s5777_s30 + $0x28] sm:$0xff] }
 0x1b9   : > { %v2550_v21 = vand.u32 4294901760, %v2549_v17  ;;  %v3065_v36 = vand.u32 4294901760, %v3064_v31  ;;  %v5812_v45 = vpack.c.bf16 %v3063_v25, %v3056_v24  ;;  %v286_v17 = vld [vmem:[%s5777_s30 + $0x20] sm:$0xff]  ;;  %v289_v24 = vld [vmem:[%s5777_s30 + $0x38] sm:$0xff] }
 0x1ba   : > { %5417 = vpow2.f32 %v2400_v51  ;;  %v3986_v30 = vand.u32 4294901760, %v289_v24 }
 0x1bb   : > { %5419 = vpow2.f32 %v2402_v50  ;;  %v5257_v38 = vpack.c.bf16 %v3065_v36, %v3058_v35 }
 0x1bd   : > { %5258 = vmatprep.subr.bf16.mxu1 %v5257_v38 }
 0x1c0   : > { %v5757_v52 = vpop.eup %5413 }
 0x1c1   : > { %v2412_v53 = vsel %vm2363_vm3, %v5757_v52, 0.0  ;;  %v5761_v54 = vpop.eup %5415 }
 0x1c2   : > { %2413 = vadd.xlane.f32.xlu0 %v2412_v53  ;;  %v2415_v57 = vsel %vm2363_vm3, %v5761_v54, 0.0 }
 0x1c4   : > { %v5763_v55 = vpop.eup %5417 }
 0x1c5   : > { %v2418_v56 = vsel %vm2363_vm3, %v5763_v55, 0.0  ;;  %v5769_v58 = vpop.eup %5419 }
 0x1c6   : > { %2419 = vadd.xlane.f32.xlu1 %v2418_v56  ;;  %2416 = vadd.xlane.f32.xlu0 %v2415_v57  ;;  %v2421_v59 = vsel %vm2363_vm3, %v5769_v58, 0.0 }
 0x1ca   : > { %2422 = vadd.xlane.f32.xlu1 %v2421_v59 }
 0x1e1   : > { %v2384_v60 = vpop.xlane.xlu1 %2383  ;;  %v2378_v16 = vpop.xlane.xlu0 %2377 }
 0x1e2   : > { %v2394_v61 = vsub.f32 %v2361_v33, %v2384_v60  ;;  %v2392_v22 = vsub.f32 %v2359_v32, %v2378_v16 }
 0x1e4   : > { %v2408_v62 = vmul.f32 1.442695, %v2394_v61  ;;  %v2404_v26 = vmul.f32 1.442695, %v2392_v22 }
 0x1e5   : > { %v2387_v0 = vpop.xlane.xlu1 %2386  ;;  %v2381_v1 = vpop.xlane.xlu0 %2380 }
 0x1e6   : > { %5421 = vpow2.f32 %v2408_v62  ;;  %v2395_v4 = vsub.f32 %v2362_v28, %v2387_v0  ;;  %v2393_v5 = vsub.f32 %v2360_v27, %v2381_v1  ;;  %v5793_v28 = vpack.c.bf16 %v2557_v23, %v2550_v21 }
 0x1e7   : > { %5423 = vpow2.f32 %v2404_v26  ;;  %v3475_v21 = vand.u32 4294901760, %v286_v17  ;;  %v3478_v23 = vand.u32 4294901760, %v287_v18 }
 0x1e8   : > { %v2410_v48 = vmul.f32 1.442695, %v2395_v4  ;;  %v2406_v49 = vmul.f32 1.442695, %v2393_v5  ;;  %5234 = vmatprep.subr.bf16.mxu0 %v5793_v28 }
 0x1ea   : > { %5425 = vpow2.f32 %v2410_v48 }
 0x1eb   : > { %5427 = vpow2.f32 %v2406_v49 }
 0x1f0   : > { %v5791_v27 = vpop.eup %5421 }
 0x1f1   : > { %v5795_v32 = vpop.eup %5423  ;;  %v2430_v33 = vsel %vm2363_vm3, %v5791_v27, 0.0 }
 0x1f2   : > { %2431 = vadd.xlane.f32.xlu1 %v2430_v33  ;;  %v2424_v34 = vsel %vm2363_vm3, %v5795_v32, 0.0  ;;  %v5849_v33 = vsub.f32 %v286_v17, %v3475_v21 }
 0x1f3   : > { %2425 = vadd.xlane.f32.xlu0 %v2424_v34  ;;  %v5851_v34 = vsub.f32 %v287_v18, %v3478_v23 }
 0x1f4   : > { %v5802_v37 = vpop.eup %5425 }
 0x1f5   : > { %v5804_v39 = vpop.eup %5427  ;;  %v2433_v40 = vsel %vm2363_vm3, %v5802_v37, 0.0  ;;  %v5285_v18 = vpack.c.bf16 %v5851_v34, %v5849_v33 }
 0x1f6   : > { %2434 = vadd.xlane.f32.xlu1 %v2433_v40  ;;  %v2427_v41 = vsel %vm2363_vm3, %v5804_v39, 0.0  ;;  %v3564_v40 = vand.u32 4294901760, %v5849_v33 }
 0x1f7   : > { %2428 = vadd.xlane.f32.xlu0 %v2427_v41  ;;  %v3571_v41 = vand.u32 4294901760, %v5851_v34 }
 0x24f   : > { %v2414_v46 = vpop.xlane.xlu0 %2413 }
 0x250   : > { %5429 = vrcp.f32 %v2414_v46 }
 0x253   : > { %v2420_v47 = vpop.xlane.xlu1 %2419  ;;  %v2417_v50 = vpop.xlane.xlu0 %2416 }
 0x254   : > { %5431 = vrcp.f32 %v2420_v47 }
 0x255   : > { %5433 = vrcp.f32 %v2417_v50  ;;  %v5868_v50 = vpack.c.bf16 %v3478_v23, %v3475_v21 }
 0x257   : > { %v2423_v51 = vpop.xlane.xlu1 %2422 }
 0x258   : > { %5435 = vrcp.f32 %v2423_v51  ;;  %v3565_v51 = vsub.f32 %v5849_v33, %v3564_v40 }
 0x25a   : > { %v5430_v53 = vpop.eup %5429 }
 0x25b   : > { %v2437_v56 = vmul.f32 %v5430_v53, %v5757_v52 }
 0x25d   : > { %v2453_v57 = vsel %vm2363_vm3, %v2437_v56, 0 }
 0x25e   : > { %v5432_v59 = vpop.eup %5431  ;;  %v5816_v60 = vand.u32 4294901760, %v2453_v57 }
 0x25f   : > { %v5434_v16 = vpop.eup %5433  ;;  %v2441_v61 = vmul.f32 %v5432_v59, %v5763_v55 }
 0x260   : > { %v2439_v22 = vmul.f32 %v5434_v16, %v5761_v54  ;;  %v2526_v62 = vsub.f32 %v2453_v57, %v5816_v60 }
 0x261   : > { %v2961_v26 = vsel %vm2363_vm3, %v2441_v61, 0 }
 0x262   : > { %v5436_v63 = vpop.eup %5435  ;;  %v2527_v29 = vand.u32 4294901760, %v2526_v62  ;;  %v2456_v0 = vsel %vm2363_vm3, %v2439_v22, 0  ;;  %v5823_v1 = vand.u32 4294901760, %v2961_v26 }
 0x263   : > { %v2443_v52 = vmul.f32 %v5436_v63, %v5769_v58  ;;  %v5826_v2 = vand.u32 4294901760, %v2456_v0 }
 0x264   : > { %v2528_v3 = vsub.f32 %v2526_v62, %v2527_v29  ;;  %v3034_v4 = vsub.f32 %v2961_v26, %v5823_v1 }
 0x265   : > { %v2536_v55 = vsub.f32 %v2456_v0, %v5826_v2  ;;  %v2964_v54 = vsel %vm2363_vm3, %v2443_v52, 0 }
 0x266   : > { %v2529_v5 = vand.u32 4294901760, %v2528_v3  ;;  %v3035_v48 = vand.u32 4294901760, %v3034_v4  ;;  %v5831_v49 = vand.u32 4294901760, %v2964_v54 }
 0x267   : > { %v2537_v7 = vand.u32 4294901760, %v2536_v55 }
 0x268   : > { %4969 = vmatprep.mubr.f32.mxu0 %v2529_v5  ;;  %v3036_v8 = vsub.f32 %v3034_v4, %v3035_v48  ;;  %v3044_v9 = vsub.f32 %v2964_v54, %v5831_v49 }
 0x269   : > { %v2538_v10 = vsub.f32 %v2536_v55, %v2537_v7 }
 0x26a   : > { %v3037_v58 = vand.u32 4294901760, %v3036_v8  ;;  %v3045_v11 = vand.u32 4294901760, %v3044_v9 }
 0x26b   : > { %v2539_v12 = vand.u32 4294901760, %v2538_v10 }
 0x26c   : > { %5011 = vmatprep.mubr.f32.mxu1 %v3037_v58  ;;  %v3046_v13 = vsub.f32 %v3044_v9, %v3045_v11 }
 0x26d   : > { %4970 = vmatmul.mubr.f32.vlgmr.msra.gmra.mrb[4].mxu0 %v2539_v12 }
 0x26e   : > { %4976 = vmatprep.mubr.f32.mxu0 %v5816_v60  ;;  %5236 = vmatpush3.bf16.msra.mxu0 %v5793_v28  ;;  %v3047_v14 = vand.u32 4294901760, %v3046_v13  ;;  %v3983_v28 = vand.u32 4294901760, %v288_v19 }
 0x26f   : > { %5238 = vmatprep.subr.bf16.mxu0 %v5237_v42 }
 0x270   : > { %5012 = vmatmul.mubr.f32.vlgmr.msra.gmra.mrb[4].mxu1 %v3047_v14  ;;  %v5853_v36 = vsub.f32 %v288_v19, %v3983_v28  ;;  %v5885_v16 = vpack.c.bf16 %v3986_v30, %v3983_v28 }
 0x271   : > { %5260 = vmatpush3.bf16.msra.mxu1 %v5257_v38  ;;  %5018 = vmatprep.mubr.f32.mxu1 %v5823_v1  ;;  %v5857_v38 = vsub.f32 %v289_v24, %v3986_v30 }
 0x272   : > { %5262 = vmatprep.subr.bf16.mxu1 %v5261_v43 }
 0x273   : > { %v5309_v19 = vpack.c.bf16 %v5857_v38, %v5853_v36 }
 0x275   : > { %4977 = vmatmul.mubr.f32.vlgmr.msra.gmra.mrb[4].mxu0 %v5826_v2 }
 0x276   : > { %4983 = vmatprep.mubr.f32.mxu0 %v2526_v62  ;;  %5240 = vmatpush3.bf16.msra.mxu0 %v5237_v42  ;;  %v4072_v42 = vand.u32 4294901760, %v5853_v36 }
 0x277   : > { %5242 = vmatprep.subr.bf16.mxu0 %v5781_v6 }
 0x278   : > { %5019 = vmatmul.mubr.f32.vlgmr.msra.gmra.mrb[4].mxu1 %v5831_v49 }
 0x279   : > { %5264 = vmatpush3.bf16.msra.mxu1 %v5261_v43  ;;  %5025 = vmatprep.mubr.f32.mxu1 %v3034_v4 }
 0x27a   : > { %5266 = vmatprep.subr.bf16.mxu1 %v5787_v15 }
 0x27d   : > { %4984 = vmatmul.mubr.f32.vlgmr.msra.gmra.mrb[4].mxu0 %v2536_v55 }
 0x27e   : > { %4990 = vmatprep.mubr.f32.mxu0 %v2527_v29  ;;  %5244 = vmatpush3.bf16.msra.mxu0 %v5781_v6 }
 0x27f   : > { %v2432_v20 = vpop.xlane.xlu1 %2431  ;;  %5246 = vmatprep.subr.bf16.mxu0 %v5810_v44 }
 0x280   : > { %5437 = vrcp.f32 %v2432_v20  ;;  %v2426_v25 = vpop.xlane.xlu0 %2425  ;;  %5026 = vmatmul.mubr.f32.vlgmr.msra.gmra.mrb[4].mxu1 %v3044_v9 }
 0x281   : > { %5439 = vrcp.f32 %v2426_v25  ;;  %5268 = vmatpush3.bf16.msra.mxu1 %v5787_v15  ;;  %5032 = vmatprep.mubr.f32.mxu1 %v3035_v48 }
 0x282   : > { %5270 = vmatprep.subr.bf16.mxu1 %v5812_v45 }
 0x283   : > { %v2435_v31 = vpop.xlane.xlu1 %2434 }
 0x284   : > { %5441 = vrcp.f32 %v2435_v31  ;;  %v2429_v35 = vpop.xlane.xlu0 %2428 }
 0x285   : > { %5443 = vrcp.f32 %v2429_v35  ;;  %4991 = vmatmul.mubr.f32.vlgmr.msra.gmra.mrb[4].mxu0 %v2537_v7 }
 0x286   : > { %4997 = vmatprep.mubr.f32.mxu0 %v5816_v60  ;;  %5248 = vmatpush3.bf16.msra.mxu0 %v5810_v44  ;;  %v4079_v44 = vand.u32 4294901760, %v5857_v38 }
 0x287   : > { %5250 = vmatprep.subr.bf16.mxu0 %v5781_v6 }
 0x288   : > { %5033 = vmatmul.mubr.f32.vlgmr.msra.gmra.mrb[4].mxu1 %v3045_v11  ;;  %v5317_v20 = vpack.c.bf16 %v4079_v44, %v4072_v42 }
 0x289   : > { %5272 = vmatpush3.bf16.msra.mxu1 %v5812_v45  ;;  %5039 = vmatprep.mubr.f32.mxu1 %v5823_v1  ;;  %v3572_v45 = vsub.f32 %v5851_v34, %v3571_v41 }
 0x28a   : > { %v5438_v43 = vpop.eup %5437  ;;  %5274 = vmatprep.subr.bf16.mxu1 %v5787_v15 }
 0x28b   : > { %v5440_v46 = vpop.eup %5439  ;;  %v2449_v47 = vmul.f32 %v5438_v43, %v5791_v27  ;;  %v4073_v27 = vsub.f32 %v5853_v36, %v4072_v42  ;;  %v3573_v63 = vand.u32 4294901760, %v3572_v45 }
 0x28c   : > { %v2445_v53 = vmul.f32 %v5440_v46, %v5795_v32  ;;  %v4080_v32 = vsub.f32 %v5857_v38, %v4079_v44 }
 0x28d   : > { %4998 = vmatmul.mubr.f32.vlgmr.msra.gmra.mrb[4].mxu0 %v5826_v2  ;;  %v3977_v56 = vsel %vm2363_vm3, %v2449_v47, 0  ;;  %v4074_v52 = vand.u32 4294901760, %v4073_v27 }
 0x28e   : > { %v5442_v57 = vpop.eup %5441  ;;  %5004 = vmatprep.mubr.f32.mxu0 %v5816_v60  ;;  %5252 = vmatpush3.bf16.msra.mxu0 %v5781_v6  ;;  %v3469_v59 = vsel %vm2363_vm3, %v2445_v53, 0  ;;  %v5887_v61 = vand.u32 4294901760, %v3977_v56  ;;  %v3566_v60 = vand.u32 4294901760, %v3565_v51  ;;  %v4081_v55 = vand.u32 4294901760, %v4080_v32 }
 0x28f   : > { %v5444_v22 = vpop.eup %5443  ;;  %v2451_v62 = vmul.f32 %v5442_v57, %v5802_v37  ;;  %5278 = vmatprep.subr.bf16.mxu0 %v5868_v50  ;;  %v5894_v26 = vand.u32 4294901760, %v3469_v59 }
 0x290   : > { %v2447_v6 = vmul.f32 %v5444_v22, %v5804_v39  ;;  %5040 = vmatmul.mubr.f32.vlgmr.msra.gmra.mrb[4].mxu1 %v5831_v49  ;;  %v4050_v29 = vsub.f32 %v3977_v56, %v5887_v61  ;;  %v5281_v48 = vpack.c.bf16 %v3573_v63, %v3566_v60  ;;  %v5305_v9 = vpack.c.bf16 %v4081_v55, %v4074_v52 }
 0x291   : > { %v3980_v0 = vsel %vm2363_vm3, %v2451_v62, 0  ;;  %5276 = vmatpush3.bf16.msra.mxu1 %v5787_v15  ;;  %5046 = vmatprep.mubr.f32.mxu1 %v5823_v1  ;;  %v3542_v37 = vsub.f32 %v3469_v59, %v5894_v26 }
 0x292   : > { %v5903_v3 = vand.u32 4294901760, %v3980_v0  ;;  %v3472_v4 = vsel %vm2363_vm3, %v2447_v6, 0  ;;  %5302 = vmatprep.subr.bf16.mxu1 %v5885_v16  ;;  %v4051_v39 = vand.u32 4294901760, %v4050_v29 }
 0x293   : > { %v5907_v54 = vand.u32 4294901760, %v3472_v4  ;;  %v3543_v5 = vand.u32 4294901760, %v3542_v37 }
 0x294   : > { %v4052_v7 = vsub.f32 %v4050_v29, %v4051_v39  ;;  %v4060_v15 = vsub.f32 %v3980_v0, %v5903_v3 }
 0x295   : > { %5005 = vmatmul.mubr.f32.vlgmr.msra.gmra.mrb[4].mxu0 %v5826_v2  ;;  %v3544_v1 = vsub.f32 %v3542_v37, %v3543_v5  ;;  %v3552_v8 = vsub.f32 %v3472_v4, %v5907_v54 }
 0x296   : > { %5280 = vmatpush3.bf16.msra.mxu0 %v5868_v50  ;;  %v4061_v10 = vand.u32 4294901760, %v4060_v15  ;;  %v4053_v12 = vand.u32 4294901760, %v4052_v7 }
 0x297   : > { %v3545_v58 = vand.u32 4294901760, %v3544_v1  ;;  %v3553_v11 = vand.u32 4294901760, %v3552_v8  ;;  %5282 = vmatprep.subr.bf16.mxu0 %v5281_v48 }
 0x298   : > { %5047 = vmatmul.mubr.f32.vlgmr.msra.gmra.mrb[4].mxu1 %v5831_v49  ;;  %v4062_v13 = vsub.f32 %v4060_v15, %v4061_v10  ;;  %v5293_v49 = vpack.c.bf16 %v3571_v41, %v3564_v40 }
 0x299   : > { %5053 = vmatprep.mubr.f32.mxu0 %v3545_v58  ;;  %5304 = vmatpush3.bf16.msra.mxu1 %v5885_v16  ;;  %v3554_v14 = vsub.f32 %v3552_v8, %v3553_v11 }
 0x29a   : > { %5095 = vmatprep.mubr.f32.mxu1 %v4053_v12  ;;  %5306 = vmatprep.subr.bf16.mxu1 %v5305_v9  ;;  %v4063_v2 = vand.u32 4294901760, %v4062_v13 }
 0x29b   : > { %v3555_v17 = vand.u32 4294901760, %v3554_v14 }
 0x29c   : > { %5096 = vmatmul.mubr.f32.vlgmr.msra.gmra.mrb[6].mxu1 %v4063_v2 }
 0x29d   : > { %5054 = vmatmul.mubr.f32.vlgmr.msra.gmra.mrb[6].mxu0 %v3555_v17  ;;  %5308 = vmatpush3.bf16.msra.mxu1 %v5305_v9 }
 0x29e   : > { %5284 = vmatpush3.bf16.msra.mxu0 %v5281_v48  ;;  %5060 = vmatprep.mubr.f32.mxu0 %v5894_v26 }
 0x29f   : > { %5102 = vmatprep.mubr.f32.mxu1 %v5887_v61  ;;  %5286 = vmatprep.subr.bf16.mxu0 %v5285_v18 }
 0x2a0   : > { %5310 = vmatprep.subr.bf16.mxu1 %v5309_v19 }
 0x2a4   : > { %5103 = vmatmul.mubr.f32.vlgmr.msra.gmra.mrb[6].mxu1 %v5903_v3 }
 0x2a5   : > { %5061 = vmatmul.mubr.f32.vlgmr.msra.gmra.mrb[6].mxu0 %v5907_v54  ;;  %5312 = vmatpush3.bf16.msra.mxu1 %v5309_v19 }
 0x2a6   : > { %5288 = vmatpush3.bf16.msra.mxu0 %v5285_v18  ;;  %5067 = vmatprep.mubr.f32.mxu0 %v3542_v37 }
 0x2a7   : > { %5109 = vmatprep.mubr.f32.mxu1 %v4050_v29  ;;  %5290 = vmatprep.subr.bf16.mxu0 %v5868_v50 }
 0x2a8   : > { %5314 = vmatprep.subr.bf16.mxu1 %v5885_v16 }
 0x2ac   : > { %5110 = vmatmul.mubr.f32.vlgmr.msra.gmra.mrb[6].mxu1 %v4060_v15 }
 0x2ad   : > { %5068 = vmatmul.mubr.f32.vlgmr.msra.gmra.mrb[6].mxu0 %v3552_v8  ;;  %5316 = vmatpush3.bf16.msra.mxu1 %v5885_v16 }
 0x2ae   : > { %5292 = vmatpush3.bf16.msra.mxu0 %v5868_v50  ;;  %5074 = vmatprep.mubr.f32.mxu0 %v3543_v5 }
 0x2af   : > { %5116 = vmatprep.mubr.f32.mxu1 %v4051_v39  ;;  %5294 = vmatprep.subr.bf16.mxu0 %v5293_v49 }
 0x2b0   : > { %5318 = vmatprep.subr.bf16.mxu1 %v5317_v20 }
 0x2b4   : > { %5117 = vmatmul.mubr.f32.vlgmr.msra.gmra.mrb[6].mxu1 %v4061_v10 }
 0x2b5   : > { %5075 = vmatmul.mubr.f32.vlgmr.msra.gmra.mrb[6].mxu0 %v3553_v11  ;;  %5320 = vmatpush3.bf16.msra.mxu1 %v5317_v20 }
 0x2b6   : > { %5296 = vmatpush3.bf16.msra.mxu0 %v5293_v49  ;;  %5081 = vmatprep.mubr.f32.mxu0 %v5894_v26 }
 0x2b7   : > { %5123 = vmatprep.mubr.f32.mxu1 %v5887_v61  ;;  %5298 = vmatprep.subr.bf16.mxu0 %v5868_v50 }
 0x2b8   : > { %5322 = vmatprep.subr.bf16.mxu1 %v5885_v16 }
 0x2bc   : > { %5124 = vmatmul.mubr.f32.vlgmr.msra.gmra.mrb[6].mxu1 %v5903_v3 }
 0x2bd   : > { %5082 = vmatmul.mubr.f32.vlgmr.msra.gmra.mrb[6].mxu0 %v5907_v54  ;;  %5324 = vmatpush3.bf16.msra.mxu1 %v5885_v16 }
 0x2be   : > { %5300 = vmatpush3.bf16.msra.mxu0 %v5868_v50  ;;  %5088 = vmatprep.mubr.f32.mxu0 %v5894_v26 }
 0x2bf   : > { %5130 = vmatprep.mubr.f32.mxu1 %v5887_v61 }
 0x2c4   : > { %5131 = vmatmul.mubr.f32.vlgmr.msra.gmra.mrb[6].mxu1 %v5903_v3 }
 0x2c5   : > { %5089 = vmatmul.mubr.f32.vlgmr.msra.gmra.mrb[6].mxu0 %v5907_v54 }
 0x368   : > { %v5006_v21 = vpop.f32.mrb[4].mxu0 }
 0x369   : > { %4485 = vst.msk [vmem:[%s257_s7 + $0x8] sm:$0xff] %vm292_vm0, %v5006_v21  ;;  %v2950_v23 = vpop.f32.mrb[5].mxu0 }
 0x36a   : > { %4484 = vst.msk [vmem:[%s257_s7] sm:$0xff] %vm292_vm0, %v2950_v23 }
 0x36b   : > { %v5048_v24 = vpop.f32.mrb[4].mxu1 }
 0x36c   : > { %4487 = vst.msk [vmem:[%s257_s7 + $0x18] sm:$0xff] %vm292_vm0, %v5048_v24  ;;  %v3458_v25 = vpop.f32.mrb[5].mxu1 }
 0x36d   : > { %4486 = vst.msk [vmem:[%s257_s7 + $0x10] sm:$0xff] %vm292_vm0, %v3458_v25 }
 0x397   : > { %v5132_v28 = vpop.f32.mrb[6].mxu1 }
 0x398   : > { %v5090_v30 = vpop.f32.mrb[6].mxu0  ;;  %4491 = vst.msk [vmem:[%s257_s7 + $0x38] sm:$0xff] %vm292_vm0, %v5132_v28  ;;  %v4474_v31 = vpop.f32.mrb[7].mxu1 }
 0x399   : > { %4489 = vst.msk [vmem:[%s257_s7 + $0x28] sm:$0xff] %vm292_vm0, %v5090_v30  ;;  %v3966_v33 = vpop.f32.mrb[7].mxu0  ;;  %4490 = vst.msk [vmem:[%s257_s7 + $0x30] sm:$0xff] %vm292_vm0, %v4474_v31 }
 0x39a   : > { %4488 = vst.msk [vmem:[%s257_s7 + $0x20] sm:$0xff] %vm292_vm0, %v3966_v33 }
 0x39b PF: > { %s14_s15 = sadd.s32 1, %s5451_s15  }
 0x39c   : > { %p11_p4 = scmp.ge.s32.totalorder %s14_s15, 4  }
 0x39e   :  { %13 = sbr.rel (!%p11_p4) target bundleno = 1 (0x1), region = 75 }

</bundles_post_ra>
